<compile_context>
chip_gen: v6e
topology: v6e:2x2x1
jax: 0.10.0
libtpu: 0.0.40
codegen_flags: <defaults>
</compile_context>

<pallas_src>
import jax
import jax.numpy as jnp
from jax.experimental import pallas as pl
from jax.experimental.pallas import tpu as pltpu

_LANE = 128


def _elemwise_kernel(x_ref, add_ref, sub_ref, mul_ref, div_ref):
    x = x_ref[...]
    add_ref[...] = x + 2.0
    sub_ref[...] = x - 1.0
    mul_ref[...] = x * 3.0
    div_ref[...] = x * 0.5  # x / 2 (exact for binary floats)


def _round_up(n, m):
    return ((n + m - 1) // m) * m


def pt_module_forward(x):
    """Computes (x + 2, x - 1, x * 3, x / 2) elementwise (PtModule.forward)."""
    orig_shape = x.shape
    dtype = x.dtype

    if not jnp.issubdtype(dtype, jnp.floating):
        # TODO(synk): integer inputs follow torch's promotion (add/sub/mul keep
        # the int dtype, div promotes to float) via plain XLA ops; the Pallas
        # kernel covers the floating-point path exercised by the spec.
        return (x + 2, x - 1, x * 3, x / 2)

    itemsize = jnp.dtype(dtype).itemsize
    total = x.size
    sub = 8 * max(1, 4 // itemsize)      # sublane multiple for this dtype
    rows = pl.cdiv(total, _LANE)         # conceptual 128-lane rows
    row_bytes = _LANE * itemsize

    # Block sizing (rows per block, per buffer):
    #   input <= 1 MiB -> single block (avoid per-step cost on 1-TC chips)
    #   medium         -> ~8 blocks of >= 1 MiB (>=4 steps/TC on v7x, pipelined)
    #   large          -> 2 MiB blocks (amortizes ~0.35us/step at 3.2 TB/s)
    target_rows = max(sub, ((2 << 20) // row_bytes) // sub * sub)
    min_rows = max(sub, ((1 << 20) // row_bytes) // sub * sub)
    if rows * row_bytes <= (1 << 20):
        tile_rows = _round_up(rows, sub)
    else:
        tile_rows = _round_up(pl.cdiv(rows, 8), sub)
        tile_rows = min(max(tile_rows, min_rows), target_rows)

    grid = (pl.cdiv(rows, tile_rows),)

    if total % _LANE == 0:
        # Copy-free lane-dense 2D view.
        xv = x.reshape(rows, _LANE)
        spec = pl.BlockSpec((tile_rows, _LANE), lambda i: (i, 0))
        out_sds = jax.ShapeDtypeStruct((rows, _LANE), dtype)
    else:
        # Copy-free flat 1D view; the ragged final block is masked by the
        # Pallas pipeline, so no host-side pad / per-output slice is needed.
        xv = x.reshape(total)
        spec = pl.BlockSpec((tile_rows * _LANE,), lambda i: (i,))
        out_sds = jax.ShapeDtypeStruct((total,), dtype)

    cost = pl.CostEstimate(
        flops=4 * total,
        transcendentals=0,
        bytes_accessed=5 * total * itemsize,  # 1 read + 4 writes per element
    )

    outs = pl.pallas_call(
        _elemwise_kernel,
        grid=grid,
        in_specs=[spec],
        out_specs=(spec, spec, spec, spec),
        out_shape=(out_sds, out_sds, out_sds, out_sds),
        compiler_params=pltpu.CompilerParams(
            # "parallel" lets the grid axis shard across both TensorCores on
            # v7x; on single-TC chips it is just a sequential loop.
            dimension_semantics=("parallel",),
            vmem_limit_bytes=48 * 1024 * 1024,
        ),
        cost_estimate=cost,
    )(xv)

    return tuple(o.reshape(orig_shape) for o in outs)


if __name__ == "__main__":
    key = jax.random.PRNGKey(0)
    x = jax.random.normal(key, (2, 4, 16, 16), dtype=jnp.float32)

    x1, x2, x3, x4 = pt_module_forward(x)
    jax.block_until_ready((x1, x2, x3, x4))

    # sanity check against plain JAX reference
    assert jnp.allclose(x1, x + 2), "add mismatch"
    assert jnp.allclose(x2, x - 1), "sub mismatch"
    assert jnp.allclose(x3, x * 3), "mul mismatch"
    assert jnp.allclose(x4, x / 2), "div mismatch"

    print("KERNEL_OK")
</pallas_src>

<mosaic_0001>
module attributes {stable_mosaic.version = 11 : i64} {
  func.func @_elemwise_kernel(%arg0: i32, %arg1: memref<16x128xf32, #tpu.memory_space<vmem>>, %arg2: memref<16x128xf32, #tpu.memory_space<vmem>>, %arg3: memref<16x128xf32, #tpu.memory_space<vmem>>, %arg4: memref<16x128xf32, #tpu.memory_space<vmem>>, %arg5: memref<16x128xf32, #tpu.memory_space<vmem>>) attributes {dimension_semantics = [#tpu.dimension_semantics<parallel>], iteration_bounds = array<i64: 1>, scalar_prefetch = 0 : i64, scratch_operands = 0 : i64, tpu.core_type = #tpu.core_type<tc>, window_params = [{transform_indices = @transform_0, window_bounds = array<i64: 16, 128>}, {transform_indices = @transform_1, window_bounds = array<i64: 16, 128>}, {transform_indices = @transform_2, window_bounds = array<i64: 16, 128>}, {transform_indices = @transform_3, window_bounds = array<i64: 16, 128>}, {transform_indices = @transform_4, window_bounds = array<i64: 16, 128>}]} {
    %c0 = arith.constant 0 : index
    %c0_0 = arith.constant 0 : index
    %0 = vector.load %arg1[%c0, %c0_0] : memref<16x128xf32, #tpu.memory_space<vmem>>, vector<16x128xf32>
    %cst = arith.constant 2.000000e+00 : f32
    %1 = vector.broadcast %cst : f32 to vector<16x128xf32>
    %2 = arith.addf %0, %1 : vector<16x128xf32>
    %c0_1 = arith.constant 0 : index
    %c0_2 = arith.constant 0 : index
    %3 = vector.load %arg2[%c0_1, %c0_2] : memref<16x128xf32, #tpu.memory_space<vmem>>, vector<16x128xf32>
    tpu.vector_store %arg2[%c0_1, %c0_2], %2 {strides = array<i32>} : memref<16x128xf32, #tpu.memory_space<vmem>>, vector<16x128xf32>,
    %cst_3 = arith.constant 1.000000e+00 : f32
    %4 = vector.broadcast %cst_3 : f32 to vector<16x128xf32>
    %5 = arith.subf %0, %4 : vector<16x128xf32>
    %c0_4 = arith.constant 0 : index
    %c0_5 = arith.constant 0 : index
    %6 = vector.load %arg3[%c0_4, %c0_5] : memref<16x128xf32, #tpu.memory_space<vmem>>, vector<16x128xf32>
    tpu.vector_store %arg3[%c0_4, %c0_5], %5 {strides = array<i32>} : memref<16x128xf32, #tpu.memory_space<vmem>>, vector<16x128xf32>,
    %cst_6 = arith.constant 3.000000e+00 : f32
    %7 = vector.broadcast %cst_6 : f32 to vector<16x128xf32>
    %8 = arith.mulf %0, %7 : vector<16x128xf32>
    %c0_7 = arith.constant 0 : index
    %c0_8 = arith.constant 0 : index
    %9 = vector.load %arg4[%c0_7, %c0_8] : memref<16x128xf32, #tpu.memory_space<vmem>>, vector<16x128xf32>
    tpu.vector_store %arg4[%c0_7, %c0_8], %8 {strides = array<i32>} : memref<16x128xf32, #tpu.memory_space<vmem>>, vector<16x128xf32>,
    %cst_9 = arith.constant 5.000000e-01 : f32
    %10 = vector.broadcast %cst_9 : f32 to vector<16x128xf32>
    %11 = arith.mulf %0, %10 : vector<16x128xf32>
    %c0_10 = arith.constant 0 : index
    %c0_11 = arith.constant 0 : index
    %12 = vector.load %arg5[%c0_10, %c0_11] : memref<16x128xf32, #tpu.memory_space<vmem>>, vector<16x128xf32>
    tpu.vector_store %arg5[%c0_10, %c0_11], %11 {strides = array<i32>} : memref<16x128xf32, #tpu.memory_space<vmem>>, vector<16x128xf32>,
    return
  }
  func.func @transform_0(%arg0: i32) -> (i32, i32) {
    %c0_i32 = arith.constant 0 : i32
    %c0_i32_0 = arith.constant 0 : i32
    return %arg0, %c0_i32 : i32, i32
  }
  func.func @transform_1(%arg0: i32) -> (i32, i32) {
    %c0_i32 = arith.constant 0 : i32
    %c0_i32_0 = arith.constant 0 : i32
    return %arg0, %c0_i32 : i32, i32
  }
  func.func @transform_2(%arg0: i32) -> (i32, i32) {
    %c0_i32 = arith.constant 0 : i32
    %c0_i32_0 = arith.constant 0 : i32
    return %arg0, %c0_i32 : i32, i32
  }
  func.func @transform_3(%arg0: i32) -> (i32, i32) {
    %c0_i32 = arith.constant 0 : i32
    %c0_i32_0 = arith.constant 0 : i32
    return %arg0, %c0_i32 : i32, i32
  }
  func.func @transform_4(%arg0: i32) -> (i32, i32) {
    %c0_i32 = arith.constant 0 : i32
    %c0_i32_0 = arith.constant 0 : i32
    return %arg0, %c0_i32 : i32, i32
  }
}

</mosaic_0001>

<bundles_post_ra>
// kernel: tpu_custom_call.1
= control target key start
LH: loop header
LB: loop body
LE: loop exit
PB: predicated region body
PF: predicated region fallthrough
CT: control target
= control target key end

     0   :  { %10 = vsyncpa [#allocation3], 0  ;;  %s311_s0 = inlined_call_operand.hbm [shape: f32[16,128], index: 0, kind: input, shape index: {}]   ;;  %s312_s1 = inlined_call_operand.hbm [shape: f32[16,128], index: 1, kind: output, shape index: {0}]   ;;  %s313_s2 = inlined_call_operand.hbm [shape: f32[16,128], index: 2, kind: output, shape index: {1}]   ;;  %s314_s3 = inlined_call_operand.hbm [shape: f32[16,128], index: 3, kind: output, shape index: {2}]   ;;  %s315_s4 = inlined_call_operand.hbm [shape: f32[16,128], index: 4, kind: output, shape index: {3}]  }
   0x1   :  { %11 = vsyncpa [#allocation4], 0 }
   0x2   :  { %12 = vsyncpa [#allocation7], 0 }
   0x3   :  { %13 = vsyncpa [#allocation10], 0  ;;  %s228_s15 = smov [#allocation2]  }
   0x4   :  { %s19_s16 = sshll.u32 %s228_s15, 4  ;;  %s20_s16 = int_to_ptr.vmem [resolvable:$true] %s19_s16 }
   0x5   :  { %s128_s17 = scalar_lea.vmem %s20_s16, 256  ;;  %p133_p1 = scmp.lt.s32.totalorder %s20_s16, %s20_s16 }
   0x6   :  { %p129_p0 = scmp.ne.s32.totalorder %s20_s16, %s128_s17  ;;  %p134_p2 = scmp.lt.s32.totalorder %s128_s17, %s128_s17 }
   0x8   :  { %p135_p3 = por %p134_p2, %p133_p1 }
   0xa   :  { %p136_p4 = pnand %p135_p3, %p129_p0 }
   0xc   :  { %139 = shalt.err (!%p136_p4)
}
   0xd   :  { %s229_s18 = smov 128   ;;  %s230_s19 = smov 8  }
   0xe   :  { %25 = dma.hbm_to_vmem [thread:$0]  %s311_s0, 256, %s20_s16, [#allocation3], %s229_s18, %s229_s18, %s230_s19  }
   0xf   :  { %220 = dma.done.wait [#allocation3], 256  }
  0x10   :  { %221 = vsyncadd [#allocation3], 4294967040  ;;  %s231_s22 = smov [#allocation6]   ;;  %s232_s24 = smov [#allocation5]   ;;  %v29_v0 = vld [vmem:[#allocation2] sm:$0xff]  ;;  %v30_v1 = vld [vmem:[#allocation2 + $0x8] sm:$0xff] }
  0x11   :  { %s64_s23 = sshll.u32 %s231_s22, 4  ;;  %s52_s25 = sshll.u32 %s232_s24, 4  ;;  %v111_v2 = vadd.f32 -1.0, %v29_v0  ;;  %v112_v3 = vadd.f32 -1.0, %v30_v1  ;;  %v31_v4 = vadd.f32 2.0, %v29_v0  ;;  %v32_v5 = vadd.f32 2.0, %v30_v1  ;;  %s65_s23 = int_to_ptr.vmem [resolvable:$true] %s64_s23  ;;  %s266_s25 = int_to_ptr.vmem [resolvable:$true] %s52_s25 }
  0x12   :  { %s233_s26 = smov [#allocation8]   ;;  %s234_s28 = smov [#allocation9]   ;;  %v39_v6 = vmul.f32 3.0, %v29_v0  ;;  %v40_v7 = vmul.f32 3.0, %v30_v1  ;;  %v43_v8 = vmul.f32 0.5, %v29_v0  ;;  %v44_v9 = vmul.f32 0.5, %v30_v1 }
  0x13   :  { %s76_s27 = sshll.u32 %s233_s26, 4  ;;  %s88_s29 = sshll.u32 %s234_s28, 4  ;;  %37 = vst [vmem:[#allocation6] sm:$0xff] %v111_v2  ;;  %38 = vst [vmem:[#allocation6 + $0x8] sm:$0xff] %v112_v3  ;;  %s268_s27 = int_to_ptr.vmem [resolvable:$true] %s76_s27  ;;  %s270_s29 = int_to_ptr.vmem [resolvable:$true] %s88_s29 }
  0x14   :  { %33 = vst [vmem:[#allocation5] sm:$0xff] %v31_v4  ;;  %34 = vst [vmem:[#allocation5 + $0x8] sm:$0xff] %v32_v5  ;;  %s140_s0 = scalar_lea.vmem %s65_s23, 256  ;;  %p145_p6 = scmp.lt.s32.totalorder %s65_s23, %s65_s23 }
  0x15   :  { %41 = vst [vmem:[#allocation8] sm:$0xff] %v39_v6  ;;  %42 = vst [vmem:[#allocation8 + $0x8] sm:$0xff] %v40_v7  ;;  %p141_p5 = scmp.ne.s32.totalorder %s65_s23, %s140_s0  ;;  %p146_p7 = scmp.lt.s32.totalorder %s140_s0, %s140_s0 }
  0x16   :  { %45 = vst [vmem:[#allocation9] sm:$0xff] %v43_v8  ;;  %46 = vst [vmem:[#allocation9 + $0x8] sm:$0xff] %v44_v9 }
  0x17   :  { %p147_p8 = por %p146_p7, %p145_p6 }
  0x19   :  { %p148_p9 = pnand %p147_p8, %p141_p5 }
  0x1b   :  { %151 = shalt.err (!%p148_p9)
}
  0x1c   :  { %70 = dma.vmem_to_hbm [thread:$0]  %s65_s23, 256, %s313_s2, [#allocation7], %s229_s18, %s229_s18, %s230_s19  }
  0x1d   :  { %s160_s6 = scalar_lea.vmem %s266_s25, 256  ;;  %p165_p11 = scmp.lt.s32.totalorder %s266_s25, %s266_s25 }
  0x1e   :  { %p161_p10 = scmp.ne.s32.totalorder %s266_s25, %s160_s6  ;;  %p166_p12 = scmp.lt.s32.totalorder %s160_s6, %s160_s6 }
  0x20   :  { %p167_p13 = por %p166_p12, %p165_p11 }
  0x22   :  { %p168_p0 = pnand %p167_p13, %p161_p10 }
  0x24   :  { %171 = shalt.err (!%p168_p0)
}
  0x25   :  { %58 = dma.vmem_to_hbm [thread:$0]  %s266_s25, 256, %s312_s1, [#allocation4], %s229_s18, %s229_s18, %s230_s19  }
  0x26   :  { %s180_s2 = scalar_lea.vmem %s268_s27, 256  ;;  %p185_p2 = scmp.lt.s32.totalorder %s268_s27, %s268_s27 }
  0x27   :  { %p181_p1 = scmp.ne.s32.totalorder %s268_s27, %s180_s2  ;;  %p186_p3 = scmp.lt.s32.totalorder %s180_s2, %s180_s2 }
  0x29   :  { %p187_p4 = por %p186_p3, %p185_p2 }
  0x2b   :  { %p188_p5 = pnand %p187_p4, %p181_p1 }
  0x2d   :  { %191 = shalt.err (!%p188_p5)
}
  0x2e   :  { %82 = dma.vmem_to_hbm [thread:$0]  %s268_s27, 256, %s314_s3, [#allocation7], %s229_s18, %s229_s18, %s230_s19  }
  0x2f   :  { %s200_s1 = scalar_lea.vmem %s270_s29, 256  ;;  %p205_p7 = scmp.lt.s32.totalorder %s270_s29, %s270_s29 }
  0x30   :  { %p201_p6 = scmp.ne.s32.totalorder %s270_s29, %s200_s1  ;;  %p206_p8 = scmp.lt.s32.totalorder %s200_s1, %s200_s1 }
  0x32   :  { %p207_p9 = por %p206_p8, %p205_p7 }
  0x34   :  { %p208_p10 = pnand %p207_p9, %p201_p6 }
  0x36   :  { %211 = shalt.err (!%p208_p10)
}
  0x37   :  { %94 = dma.vmem_to_hbm [thread:$0]  %s270_s29, 256, %s315_s4, [#allocation10], %s229_s18, %s229_s18, %s230_s19  }
  0x38   :  { %222 = dma.done.wait [#allocation4], 256  }
  0x39   :  { %223 = vsyncadd [#allocation4], 4294967040 }
  0x3a   :  { %224 = dma.done.wait [#allocation7], 512  }
  0x3b   :  { %225 = vsyncadd [#allocation7], 4294966784 }
  0x3c   :  { %226 = dma.done.wait [#allocation10], 256  }
  0x3d   :  { %227 = vsyncadd [#allocation10], 4294967040 }
  0x3e   :  { %107 = vsyncpa [#allocation3], 1 }
  0x3f   :  { %108 = vsyncpa [#allocation4], 1 }
  0x40   :  { %109 = vsyncpa [#allocation7], 1 }
  0x41   :  { %110 = vsyncpa [#allocation10], 1 }

</bundles_post_ra>
